<compile_context>
chip_gen: v7x
topology: tpu7x:2x2x1
jax: 0.10.0
libtpu: 0.0.40
codegen_flags: <defaults>
</compile_context>

<pallas_src>
import functools
import math

import jax
import jax.numpy as jnp
from jax import lax
from jax.experimental import pallas as pl
from jax.experimental.pallas import tpu as pltpu

_LANE = 128


# --------------------------------------------------------------------------
# VMEM budgeting helpers
# --------------------------------------------------------------------------
def _vmem_cap_bytes():
  """Physical VMEM of the current chip (fallback: v7x's 64 MiB per core)."""
  try:
    return int(pltpu.get_tpu_info().vmem_capacity_bytes)
  except Exception:  # pragma: no cover - info query only; never masks kernels
    return 64 << 20


def _vmem_limit(resident_bytes, pipelined_bytes, scratch_bytes=0):
  """Scoped-VMEM limit from actual sizes: resident weights + double-buffered
  activation blocks + in-kernel intermediates + headroom, clamped to chip."""
  cap = _vmem_cap_bytes()
  need = int(resident_bytes + 2 * pipelined_bytes + scratch_bytes + (16 << 20))
  return max(32 << 20, min(need, cap - (4 << 20)))


def _nbytes(*arrays):
  return sum(int(a.size) * a.dtype.itemsize for a in arrays)


def _resident_spec():
  # Whole array, VMEM-resident once for the entire grid: single copy, no
  # double-buffering, no re-DMA per grid step.
  return pl.BlockSpec(memory_space=pltpu.MemorySpace.VMEM)


def _pick_m_tile(m):
  # Prefer 256 token rows (v6e/v7x MXU height).  A non-dividing M falls back
  # to one full-extent block (legal: block dim == array dim).
  for t in (256, 128, 64, 32, 16, 8):
    if m % t == 0:
      return t
  return m


# --------------------------------------------------------------------------
# Shared in-kernel math
# --------------------------------------------------------------------------
def _mm_nt(a, b):
  """[M, K] x [N, K] -> [M, N]: contract the LAST dims of both operands
  (MXU-native NT orientation, no transposed weight tiles)."""
  return lax.dot_general(a, b, (((1,), (1,)), ((), ())),
                         preferred_element_type=jnp.float32)


def _layer_norm(h, g, b, eps):
  mu = jnp.mean(h, axis=-1, keepdims=True)
  var = jnp.mean(jnp.square(h - mu), axis=-1, keepdims=True)
  return (h - mu) * lax.rsqrt(var + eps) * g + b


# --------------------------------------------------------------------------
# Kernel 1: fused QKV projection over flattened tokens (big-M GEMM)
# --------------------------------------------------------------------------
def _qkv_proj_kernel(x_ref, w_ref, b_ref, o_ref):
  x = x_ref[...].astype(jnp.bfloat16)
  acc = _mm_nt(x, w_ref[...]) + b_ref[...]          # f32 accumulation + bias
  o_ref[...] = acc.astype(o_ref.dtype)              # bf16 out (feeds MXU next)


def _qkv_projection(x2d, wqkv, bqkv):
  m, d = x2d.shape
  three_d = wqkv.shape[0]
  tm = _pick_m_tile(m)
  limit = _vmem_limit(_nbytes(wqkv, bqkv),
                      tm * d * 4 + tm * three_d * 2,
                      scratch_bytes=tm * three_d * 4)
  return pl.pallas_call(
      _qkv_proj_kernel,
      out_shape=jax.ShapeDtypeStruct((m, three_d), jnp.bfloat16),
      grid=(m // tm,),
      in_specs=[pl.BlockSpec((tm, d), lambda i: (i, 0)),
                _resident_spec(), _resident_spec()],
      out_specs=pl.BlockSpec((tm, three_d), lambda i: (i, 0)),
      compiler_params=pltpu.CompilerParams(
          dimension_semantics=("parallel",),
          vmem_limit_bytes=limit),
  )(x2d, wqkv, bqkv)


# --------------------------------------------------------------------------
# Kernel 2: causal-softmax attention core, one (batch, head) per grid step
# --------------------------------------------------------------------------
def _attention_kernel(q_ref, k_ref, v_ref, o_ref):
  q = q_ref[0, 0]                                   # [T, hp] bf16 (pre-scaled)
  k = k_ref[0, 0]
  v = v_ref[0, 0]
  t = q.shape[0]
  logits = _mm_nt(q, k)                             # [T, T] f32
  row = lax.broadcasted_iota(jnp.int32, (t, t), 0)
  col = lax.broadcasted_iota(jnp.int32, (t, t), 1)
  logits = jnp.where(col <= row, logits, -1e30)     # causal mask, per step
  logits = logits - jnp.max(logits, axis=-1, keepdims=True)
  p = jnp.exp(logits)                               # f32 EUP (v5e-safe)
  p = p * pl.reciprocal(jnp.sum(p, axis=-1, keepdims=True), approx=True)
  o = jnp.dot(p.astype(jnp.bfloat16), v, preferred_element_type=jnp.float32)
  o_ref[0, 0] = o.astype(o_ref.dtype)


def _masked_attention(q, k, v):
  b, h, t, hp = q.shape
  spec = pl.BlockSpec((1, 1, t, hp), lambda i, j: (i, j, 0, 0))
  limit = _vmem_limit(0, 4 * t * hp * 2, scratch_bytes=3 * t * t * 4)
  return pl.pallas_call(
      _attention_kernel,
      out_shape=jax.ShapeDtypeStruct((b, h, t, hp), jnp.bfloat16),
      grid=(b, h),
      in_specs=[spec, spec, spec],
      out_specs=spec,
      compiler_params=pltpu.CompilerParams(
          dimension_semantics=("parallel", "parallel"),
          vmem_limit_bytes=limit),
  )(q, k, v)


# --------------------------------------------------------------------------
# Kernel 3: mix projection + residual/LN1 + FFN + residual/LN2 over token tiles
# --------------------------------------------------------------------------
def _mix_ffn_kernel(x_ref, attn_ref, wmix_ref, bmix_ref, ln1g_ref, ln1b_ref,
                    fc1w_ref, fc1b_ref, fc2w_ref, fc2b_ref, ln2g_ref, ln2b_ref,
                    o_ref, *, eps):
  x = x_ref[...]                                    # [tm, D] f32
  a = _mm_nt(attn_ref[...], wmix_ref[...]) + bmix_ref[...]
  h1 = _layer_norm(x + a, ln1g_ref[...], ln1b_ref[...], eps)
  f = _mm_nt(h1.astype(jnp.bfloat16), fc1w_ref[...]) + fc1b_ref[...]
  f = jnp.maximum(f, 0.0)
  f = _mm_nt(f.astype(jnp.bfloat16), fc2w_ref[...]) + fc2b_ref[...]
  f = jnp.maximum(f, 0.0)
  out = _layer_norm(h1 + f, ln2g_ref[...], ln2b_ref[...], eps)
  o_ref[...] = out.astype(o_ref.dtype)


def _mix_ffn(x2d, attn2d, prep, *, eps, out_dtype):
  m, d = x2d.shape
  hidden = prep["fc1_w"].shape[0]
  tm = _pick_m_tile(m)
  weights = (prep["wmix"], prep["bmix"], prep["ln1_g"], prep["ln1_b"],
             prep["fc1_w"], prep["fc1_b"], prep["fc2_w"], prep["fc2_b"],
             prep["ln2_g"], prep["ln2_b"])
  limit = _vmem_limit(
      _nbytes(*weights),
      tm * d * 4 + tm * d * 2 + tm * d * jnp.dtype(out_dtype).itemsize,
      scratch_bytes=2 * tm * hidden * 4 + 4 * tm * d * 4)
  kernel = functools.partial(_mix_ffn_kernel, eps=eps)
  in_specs = [pl.BlockSpec((tm, d), lambda i: (i, 0)),
              pl.BlockSpec((tm, d), lambda i: (i, 0))]
  in_specs += [_resident_spec() for _ in weights]
  return pl.pallas_call(
      kernel,
      out_shape=jax.ShapeDtypeStruct((m, d), out_dtype),
      grid=(m // tm,),
      in_specs=in_specs,
      out_specs=pl.BlockSpec((tm, d), lambda i: (i, 0)),
      compiler_params=pltpu.CompilerParams(
          dimension_semantics=("parallel",),
          vmem_limit_bytes=limit),
  )(x2d, attn2d, *weights)


# --------------------------------------------------------------------------
# Host-side wrapper
# --------------------------------------------------------------------------
def prepare_params(params, *, num_heads):
  """One-time host prep (hoisted out of the per-call path):
  - fold the 1/sqrt(head_dim) attention scale into the q rows of wqkv/bqkv,
  - cast MXU-facing weights to bf16 (halves weight HBM DMA + VMEM residency).
  Biases / LayerNorm params stay f32 (f32 accumulators / VPU math)."""
  d = params["wmix"].shape[0]
  hd = d // num_heads
  scale = 1.0 / math.sqrt(hd)
  wqkv = params["wqkv"]
  bqkv = params["bqkv"]
  wqkv = jnp.concatenate([wqkv[:d], wqkv[d:2 * d] * scale, wqkv[2 * d:]], 0)
  bqkv = jnp.concatenate(
      [bqkv[:, :d], bqkv[:, d:2 * d] * scale, bqkv[:, 2 * d:]], 1)
  prep = dict(params)
  prep["wqkv"] = wqkv.astype(jnp.bfloat16)
  prep["bqkv"] = bqkv
  for name in ("wmix", "fc1_w", "fc2_w"):
    prep[name] = params[name].astype(jnp.bfloat16)
  return prep


@functools.partial(jax.jit, static_argnames=("num_heads", "eps", "out_dtype"))
def attention_layer(x, prep, *, num_heads, eps=1e-5, out_dtype=jnp.float32):
  """Forward pass of AttentionLayer; `prep` must come from prepare_params."""
  b, t, d = x.shape
  assert d % num_heads == 0, "depth must be divisible by num_heads"
  hd = d // num_heads
  hp = -(-hd // _LANE) * _LANE          # lane-aligned head dim (zero-padded)
  m = b * t
  x2d = x.reshape(m, d)

  # 1) fused QKV projection over all tokens.
  qkv = _qkv_projection(x2d, prep["wqkv"], prep["bqkv"])      # [M, 3D] bf16

  # Split order matches the PyTorch module: k, q, v.  Head-major, lane-padded.
  def to_heads(flat):
    arr = flat.reshape(b, t, num_heads, hd).transpose(0, 2, 1, 3)  # [B,H,T,hd]
    if hp != hd:
      arr = jnp.pad(arr, ((0, 0), (0, 0), (0, 0), (0, hp - hd)))
    return arr

  k = to_heads(qkv[:, :d])
  q = to_heads(qkv[:, d:2 * d])
  v = to_heads(qkv[:, 2 * d:])

  # 2) causal-softmax attention core over (batch, head).
  o = _masked_attention(q, k, v)                              # [B,H,T,hp] bf16
  attn2d = o.transpose(0, 2, 1, 3)[..., :hd].reshape(m, d)    # [M, D] bf16

  # 3) mix + residual/LN1 + FFN + residual/LN2 over token tiles.
  out2d = _mix_ffn(x2d, attn2d, prep, eps=eps, out_dtype=out_dtype)
  return out2d.reshape(b, t, d)


# --------------------------------------------------------------------------
# Pure-JAX f32 reference mirroring the PyTorch forward
# --------------------------------------------------------------------------
def reference(x, params, *, num_heads, eps=1e-5):
  B, T, D = x.shape
  hd = D // num_heads

  def ln(h, g, b):
    mu = h.mean(-1, keepdims=True)
    var = ((h - mu) ** 2).mean(-1, keepdims=True)
    return (h - mu) / jnp.sqrt(var + eps) * g + b

  qkv = jnp.einsum("btd,od->bto", x, params["wqkv"]) + params["bqkv"]
  k, q, v = qkv[..., :D], qkv[..., D:2 * D], qkv[..., 2 * D:]
  k = k.reshape(B, T, num_heads, hd)
  q = q.reshape(B, T, num_heads, hd)
  v = v.reshape(B, T, num_heads, hd)
  logits = jnp.einsum("bthd,bshd->bhts", q, k) / math.sqrt(hd)
  mask = jnp.tril(jnp.ones((T, T), dtype=bool))
  logits = jnp.where(mask, logits, -jnp.inf)
  w = jax.nn.softmax(logits, axis=-1)
  o = jnp.einsum("bhts,bshd->bthd", w, v).reshape(B, T, D)
  attn = o @ params["wmix"].T + params["bmix"]
  h1 = ln(x + attn, params["ln1_g"], params["ln1_b"])
  f = jax.nn.relu(h1 @ params["fc1_w"].T + params["fc1_b"])
  f = jax.nn.relu(f @ params["fc2_w"].T + params["fc2_b"])
  return ln(h1 + f, params["ln2_g"], params["ln2_b"])


def init_params(key, depth, hidden):
  ks = jax.random.split(key, 8)
  s = 0.05
  return {
      "wqkv": jax.random.normal(ks[0], (3 * depth, depth), jnp.float32) * s,
      "bqkv": jax.random.normal(ks[1], (1, 3 * depth), jnp.float32) * s,
      "wmix": jax.random.normal(ks[2], (depth, depth), jnp.float32) * s,
      "bmix": jax.random.normal(ks[3], (1, depth), jnp.float32) * s,
      "ln1_g": jnp.ones((1, depth), jnp.float32),
      "ln1_b": jnp.zeros((1, depth), jnp.float32),
      "fc1_w": jax.random.normal(ks[4], (hidden, depth), jnp.float32) * s,
      "fc1_b": jax.random.normal(ks[5], (1, hidden), jnp.float32) * s,
      "fc2_w": jax.random.normal(ks[6], (depth, hidden), jnp.float32) * s,
      "fc2_b": jax.random.normal(ks[7], (1, depth), jnp.float32) * s,
      "ln2_g": jnp.ones((1, depth), jnp.float32),
      "ln2_b": jnp.zeros((1, depth), jnp.float32),
  }


if __name__ == "__main__":
  B, T, DEPTH, NUM_HEADS, HIDDEN = 2, 8, 32, 4, 64  # small stand-in sizes

  key = jax.random.PRNGKey(0)
  kp, kx = jax.random.split(key)
  params = init_params(kp, DEPTH, HIDDEN)
  x = jax.random.normal(kx, (B, T, DEPTH), jnp.float32)

  prep = prepare_params(params, num_heads=NUM_HEADS)   # hoisted one-time prep
  out = attention_layer(x, prep, num_heads=NUM_HEADS)
  out = jax.block_until_ready(out)

  ref = reference(x, params, num_heads=NUM_HEADS)
  assert out.shape == (B, T, DEPTH)
  assert jnp.all(jnp.isfinite(out))
  # bf16 MXU operands (f32 accumulation) + approx reciprocal => loose tolerance.
  assert jnp.max(jnp.abs(out - ref)) < 5e-2, "Pallas kernel mismatch vs reference"

  print("KERNEL_OK")
</pallas_src>

<mosaic_0001>
module attributes {stable_mosaic.version = 11 : i64} {
  func.func @_qkv_proj_kernel(%arg0: i32, %arg1: memref<16x32xf32, #tpu.memory_space<vmem>>, %arg2: memref<96x32xbf16, #tpu.memory_space<vmem>>, %arg3: memref<1x96xf32, #tpu.memory_space<vmem>>, %arg4: memref<16x96xbf16, #tpu.memory_space<vmem>>) attributes {dimension_semantics = [#tpu.dimension_semantics<parallel>], iteration_bounds = array<i64: 1>, scalar_prefetch = 0 : i64, scratch_operands = 0 : i64, tpu.core_type = #tpu.core_type<tc>, window_params = [{transform_indices = @transform_0, window_bounds = array<i64: 16, 32>}, {pipeline_mode = #tpu.pipeline_mode<synchronous>, transform_indices = @transform_1, window_bounds = array<i64: 96, 32>}, {pipeline_mode = #tpu.pipeline_mode<synchronous>, transform_indices = @transform_2, window_bounds = array<i64: 1, 96>}, {transform_indices = @transform_3, window_bounds = array<i64: 16, 96>}]} {
    %c0 = arith.constant 0 : index
    %c0_0 = arith.constant 0 : index
    %0 = vector.load %arg1[%c0, %c0_0] : memref<16x32xf32, #tpu.memory_space<vmem>>, vector<16x32xf32>
    %1 = arith.truncf %0 : vector<16x32xf32> to vector<16x32xbf16>
    %c0_1 = arith.constant 0 : index
    %c0_2 = arith.constant 0 : index
    %2 = vector.load %arg2[%c0_1, %c0_2] : memref<96x32xbf16, #tpu.memory_space<vmem>>, vector<96x32xbf16>
    %cst = arith.constant dense<0.000000e+00> : vector<16x96xf32>
    %3 = tpu.matmul %1, %2, %cst {dimension_numbers = #tpu.dot_dimension_numbers<[1], [1], [0], [0], [0, 0, 1, 0], [], []>} : vector<16x32xbf16>, vector<96x32xbf16>, vector<16x96xf32> -> vector<16x96xf32>
    %c0_3 = arith.constant 0 : index
    %c0_4 = arith.constant 0 : index
    %4 = vector.load %arg3[%c0_3, %c0_4] : memref<1x96xf32, #tpu.memory_space<vmem>>, vector<1x96xf32>
    %5 = vector.broadcast %4 : vector<1x96xf32> to vector<16x96xf32>
    %6 = arith.addf %3, %5 : vector<16x96xf32>
    %7 = arith.truncf %6 : vector<16x96xf32> to vector<16x96xbf16>
    %c0_5 = arith.constant 0 : index
    %c0_6 = arith.constant 0 : index
    %8 = vector.load %arg4[%c0_5, %c0_6] : memref<16x96xbf16, #tpu.memory_space<vmem>>, vector<16x96xbf16>
    tpu.vector_store %arg4[%c0_5, %c0_6], %7 {strides = array<i32>} : memref<16x96xbf16, #tpu.memory_space<vmem>>, vector<16x96xbf16>,
    return
  }
  func.func @transform_0(%arg0: i32) -> (i32, i32) {
    %c0_i32 = arith.constant 0 : i32
    %c0_i32_0 = arith.constant 0 : i32
    return %arg0, %c0_i32 : i32, i32
  }
  func.func @transform_1(%arg0: i32) -> (i32, i32) {
    %c0_i32 = arith.constant 0 : i32
    %c0_i32_0 = arith.constant 0 : i32
    %c0_i32_1 = arith.constant 0 : i32
    return %c0_i32, %c0_i32_0 : i32, i32
  }
  func.func @transform_2(%arg0: i32) -> (i32, i32) {
    %c0_i32 = arith.constant 0 : i32
    %c0_i32_0 = arith.constant 0 : i32
    %c0_i32_1 = arith.constant 0 : i32
    return %c0_i32, %c0_i32_0 : i32, i32
  }
  func.func @transform_3(%arg0: i32) -> (i32, i32) {
    %c0_i32 = arith.constant 0 : i32
    %c0_i32_0 = arith.constant 0 : i32
    return %arg0, %c0_i32 : i32, i32
  }
}

module attributes {stable_mosaic.version = 11 : i64} {
  func.func @_attention_kernel(%arg0: i32, %arg1: i32, %arg2: memref<1x1x8x128xbf16, #tpu.memory_space<vmem>>, %arg3: memref<1x1x8x128xbf16, #tpu.memory_space<vmem>>, %arg4: memref<1x1x8x128xbf16, #tpu.memory_space<vmem>>, %arg5: memref<1x1x8x128xbf16, #tpu.memory_space<vmem>>) attributes {dimension_semantics = [#tpu.dimension_semantics<parallel>, #tpu.dimension_semantics<parallel>], iteration_bounds = array<i64: 2, 4>, scalar_prefetch = 0 : i64, scratch_operands = 0 : i64, tpu.core_type = #tpu.core_type<tc>, window_params = [{transform_indices = @transform_0, window_bounds = array<i64: 1, 1, 8, 128>}, {transform_indices = @transform_1, window_bounds = array<i64: 1, 1, 8, 128>}, {transform_indices = @transform_2, window_bounds = array<i64: 1, 1, 8, 128>}, {transform_indices = @transform_3, window_bounds = array<i64: 1, 1, 8, 128>}]} {
    %c0 = arith.constant 0 : index
    %c0_0 = arith.constant 0 : index
    %c0_1 = arith.constant 0 : index
    %c0_2 = arith.constant 0 : index
    %0 = vector.load %arg2[%c0, %c0_0, %c0_1, %c0_2] : memref<1x1x8x128xbf16, #tpu.memory_space<vmem>>, vector<1x1x8x128xbf16>
    %1 = vector.shape_cast %0 : vector<1x1x8x128xbf16> to vector<8x128xbf16>
    %c0_3 = arith.constant 0 : index
    %c0_4 = arith.constant 0 : index
    %c0_5 = arith.constant 0 : index
    %c0_6 = arith.constant 0 : index
    %2 = vector.load %arg3[%c0_3, %c0_4, %c0_5, %c0_6] : memref<1x1x8x128xbf16, #tpu.memory_space<vmem>>, vector<1x1x8x128xbf16>
    %3 = vector.shape_cast %2 : vector<1x1x8x128xbf16> to vector<8x128xbf16>
    %c0_7 = arith.constant 0 : index
    %c0_8 = arith.constant 0 : index
    %c0_9 = arith.constant 0 : index
    %c0_10 = arith.constant 0 : index
    %4 = vector.load %arg4[%c0_7, %c0_8, %c0_9, %c0_10] : memref<1x1x8x128xbf16, #tpu.memory_space<vmem>>, vector<1x1x8x128xbf16>
    %5 = vector.shape_cast %4 : vector<1x1x8x128xbf16> to vector<8x128xbf16>
    %cst = arith.constant dense<0.000000e+00> : vector<8x8xf32>
    %6 = tpu.matmul %1, %3, %cst {dimension_numbers = #tpu.dot_dimension_numbers<[1], [1], [0], [0], [0, 0, 1, 0], [], []>} : vector<8x128xbf16>, vector<8x128xbf16>, vector<8x8xf32> -> vector<8x8xf32>
    %7 = tpu.iota {dimensions = array<i32: 0>} : vector<8x8xi32>
    %8 = tpu.iota {dimensions = array<i32: 1>} : vector<8x8xi32>
    %9 = arith.cmpi sle, %8, %7 : vector<8x8xi32>
    %cst_11 = arith.constant -1.000000e+30 : f32
    %10 = vector.broadcast %cst_11 : f32 to vector<8x8xf32>
    %11 = arith.select %9, %6, %10 : vector<8x8xi1>, vector<8x8xf32>
    %cst_12 = arith.constant dense<0xFF800000> : vector<8xf32>
    %12 = vector.multi_reduction <maximumf>, %11, %cst_12 [1] : vector<8x8xf32> to vector<8xf32>
    %13 = vector.shape_cast %12 : vector<8xf32> to vector<8x1xf32>
    %14 = vector.broadcast %13 : vector<8x1xf32> to vector<8x8xf32>
    %15 = arith.subf %11, %14 : vector<8x8xf32>
    %16 = math.exp %15 : vector<8x8xf32>
    %cst_13 = arith.constant dense<0.000000e+00> : vector<8xf32>
    %17 = vector.multi_reduction <add>, %16, %cst_13 [1] : vector<8x8xf32> to vector<8xf32>
    %18 = vector.shape_cast %17 : vector<8xf32> to vector<8x1xf32>
    %19 = tpu.reciprocal %18 {approx = true} : vector<8x1xf32> -> vector<8x1xf32>
    %20 = vector.broadcast %19 : vector<8x1xf32> to vector<8x8xf32>
    %21 = arith.mulf %16, %20 : vector<8x8xf32>
    %22 = arith.truncf %21 : vector<8x8xf32> to vector<8x8xbf16>
    %cst_14 = arith.constant dense<0.000000e+00> : vector<8x128xf32>
    %23 = tpu.matmul %22, %5, %cst_14 {dimension_numbers = #tpu.dot_dimension_numbers<[1], [0], [0], [1], [0, 0, 1, 1], [], []>} : vector<8x8xbf16>, vector<8x128xbf16>, vector<8x128xf32> -> vector<8x128xf32>
    %24 = arith.truncf %23 : vector<8x128xf32> to vector<8x128xbf16>
    %c0_15 = arith.constant 0 : index
    %c0_16 = arith.constant 0 : index
    %c0_17 = arith.constant 0 : index
    %c0_18 = arith.constant 0 : index
    %25 = vector.load %arg5[%c0_15, %c0_16, %c0_17, %c0_18] : memref<1x1x8x128xbf16, #tpu.memory_space<vmem>>, vector<1x1x8x128xbf16>
    %26 = vector.shape_cast %25 : vector<1x1x8x128xbf16> to vector<8x128xbf16>
    %27 = vector.shape_cast %24 : vector<8x128xbf16> to vector<1x1x8x128xbf16>
    tpu.vector_store %arg5[%c0_15, %c0_16, %c0_17, %c0_18], %27 {strides = array<i32>} : memref<1x1x8x128xbf16, #tpu.memory_space<vmem>>, vector<1x1x8x128xbf16>,
    return
  }
  func.func @transform_0(%arg0: i32, %arg1: i32) -> (i32, i32, i32, i32) {
    %c0_i32 = arith.constant 0 : i32
    %c0_i32_0 = arith.constant 0 : i32
    %c0_i32_1 = arith.constant 0 : i32
    return %arg0, %arg1, %c0_i32, %c0_i32_0 : i32, i32, i32, i32
  }
  func.func @transform_1(%arg0: i32, %arg1: i32) -> (i32, i32, i32, i32) {
    %c0_i32 = arith.constant 0 : i32
    %c0_i32_0 = arith.constant 0 : i32
    %c0_i32_1 = arith.constant 0 : i32
    return %arg0, %arg1, %c0_i32, %c0_i32_0 : i32, i32, i32, i32
  }
  func.func @transform_2(%arg0: i32, %arg1: i32) -> (i32, i32, i32, i32) {
    %c0_i32 = arith.constant 0 : i32
    %c0_i32_0 = arith.constant 0 : i32
    %c0_i32_1 = arith.constant 0 : i32
    return %arg0, %arg1, %c0_i32, %c0_i32_0 : i32, i32, i32, i32
  }
  func.func @transform_3(%arg0: i32, %arg1: i32) -> (i32, i32, i32, i32) {
    %c0_i32 = arith.constant 0 : i32
    %c0_i32_0 = arith.constant 0 : i32
    %c0_i32_1 = arith.constant 0 : i32
    return %arg0, %arg1, %c0_i32, %c0_i32_0 : i32, i32, i32, i32
  }
}

module attributes {stable_mosaic.version = 11 : i64} {
  func.func @_mix_ffn_kernel(%arg0: i32, %arg1: memref<16x32xf32, #tpu.memory_space<vmem>>, %arg2: memref<16x32xbf16, #tpu.memory_space<vmem>>, %arg3: memref<32x32xbf16, #tpu.memory_space<vmem>>, %arg4: memref<1x32xf32, #tpu.memory_space<vmem>>, %arg5: memref<1x32xf32, #tpu.memory_space<vmem>>, %arg6: memref<1x32xf32, #tpu.memory_space<vmem>>, %arg7: memref<64x32xbf16, #tpu.memory_space<vmem>>, %arg8: memref<1x64xf32, #tpu.memory_space<vmem>>, %arg9: memref<32x64xbf16, #tpu.memory_space<vmem>>, %arg10: memref<1x32xf32, #tpu.memory_space<vmem>>, %arg11: memref<1x32xf32, #tpu.memory_space<vmem>>, %arg12: memref<1x32xf32, #tpu.memory_space<vmem>>, %arg13: memref<16x32xf32, #tpu.memory_space<vmem>>) attributes {dimension_semantics = [#tpu.dimension_semantics<parallel>], iteration_bounds = array<i64: 1>, scalar_prefetch = 0 : i64, scratch_operands = 0 : i64, tpu.core_type = #tpu.core_type<tc>, window_params = [{transform_indices = @transform_0, window_bounds = array<i64: 16, 32>}, {transform_indices = @transform_1, window_bounds = array<i64: 16, 32>}, {pipeline_mode = #tpu.pipeline_mode<synchronous>, transform_indices = @transform_2, window_bounds = array<i64: 32, 32>}, {pipeline_mode = #tpu.pipeline_mode<synchronous>, transform_indices = @transform_3, window_bounds = array<i64: 1, 32>}, {pipeline_mode = #tpu.pipeline_mode<synchronous>, transform_indices = @transform_4, window_bounds = array<i64: 1, 32>}, {pipeline_mode = #tpu.pipeline_mode<synchronous>, transform_indices = @transform_5, window_bounds = array<i64: 1, 32>}, {pipeline_mode = #tpu.pipeline_mode<synchronous>, transform_indices = @transform_6, window_bounds = array<i64: 64, 32>}, {pipeline_mode = #tpu.pipeline_mode<synchronous>, transform_indices = @transform_7, window_bounds = array<i64: 1, 64>}, {pipeline_mode = #tpu.pipeline_mode<synchronous>, transform_indices = @transform_8, window_bounds = array<i64: 32, 64>}, {pipeline_mode = #tpu.pipeline_mode<synchronous>, transform_indices = @transform_9, window_bounds = array<i64: 1, 32>}, {pipeline_mode = #tpu.pipeline_mode<synchronous>, transform_indices = @transform_10, window_bounds = array<i64: 1, 32>}, {pipeline_mode = #tpu.pipeline_mode<synchronous>, transform_indices = @transform_11, window_bounds = array<i64: 1, 32>}, {transform_indices = @transform_12, window_bounds = array<i64: 16, 32>}]} {
    %c0 = arith.constant 0 : index
    %c0_0 = arith.constant 0 : index
    %0 = vector.load %arg1[%c0, %c0_0] : memref<16x32xf32, #tpu.memory_space<vmem>>, vector<16x32xf32>
    %c0_1 = arith.constant 0 : index
    %c0_2 = arith.constant 0 : index
    %1 = vector.load %arg2[%c0_1, %c0_2] : memref<16x32xbf16, #tpu.memory_space<vmem>>, vector<16x32xbf16>
    %c0_3 = arith.constant 0 : index
    %c0_4 = arith.constant 0 : index
    %2 = vector.load %arg3[%c0_3, %c0_4] : memref<32x32xbf16, #tpu.memory_space<vmem>>, vector<32x32xbf16>
    %cst = arith.constant dense<0.000000e+00> : vector<16x32xf32>
    %3 = tpu.matmul %1, %2, %cst {dimension_numbers = #tpu.dot_dimension_numbers<[1], [1], [0], [0], [0, 0, 1, 0], [], []>} : vector<16x32xbf16>, vector<32x32xbf16>, vector<16x32xf32> -> vector<16x32xf32>
    %c0_5 = arith.constant 0 : index
    %c0_6 = arith.constant 0 : index
    %4 = vector.load %arg4[%c0_5, %c0_6] : memref<1x32xf32, #tpu.memory_space<vmem>>, vector<1x32xf32>
    %5 = vector.broadcast %4 : vector<1x32xf32> to vector<16x32xf32>
    %6 = arith.addf %3, %5 : vector<16x32xf32>
    %7 = arith.addf %0, %6 : vector<16x32xf32>
    %c0_7 = arith.constant 0 : index
    %c0_8 = arith.constant 0 : index
    %8 = vector.load %arg5[%c0_7, %c0_8] : memref<1x32xf32, #tpu.memory_space<vmem>>, vector<1x32xf32>
    %c0_9 = arith.constant 0 : index
    %c0_10 = arith.constant 0 : index
    %9 = vector.load %arg6[%c0_9, %c0_10] : memref<1x32xf32, #tpu.memory_space<vmem>>, vector<1x32xf32>
    %cst_11 = arith.constant dense<0.000000e+00> : vector<16xf32>
    %10 = vector.multi_reduction <add>, %7, %cst_11 [1] : vector<16x32xf32> to vector<16xf32>
    %11 = vector.shape_cast %10 : vector<16xf32> to vector<16x1xf32>
    %cst_12 = arith.constant 3.200000e+01 : f32
    %12 = vector.broadcast %cst_12 : f32 to vector<16x1xf32>
    %13 = arith.divf %11, %12 : vector<16x1xf32>
    %14 = vector.broadcast %13 : vector<16x1xf32> to vector<16x32xf32>
    %15 = arith.subf %7, %14 : vector<16x32xf32>
    %16 = arith.mulf %15, %15 : vector<16x32xf32>
    %cst_13 = arith.constant dense<0.000000e+00> : vector<16xf32>
    %17 = vector.multi_reduction <add>, %16, %cst_13 [1] : vector<16x32xf32> to vector<16xf32>
    %18 = vector.shape_cast %17 : vector<16xf32> to vector<16x1xf32>
    %cst_14 = arith.constant 3.200000e+01 : f32
    %19 = vector.broadcast %cst_14 : f32 to vector<16x1xf32>
    %20 = arith.divf %18, %19 : vector<16x1xf32>
    %21 = vector.broadcast %13 : vector<16x1xf32> to vector<16x32xf32>
    %22 = arith.subf %7, %21 : vector<16x32xf32>
    %cst_15 = arith.constant 9.99999974E-6 : f32
    %23 = vector.broadcast %cst_15 : f32 to vector<16x1xf32>
    %24 = arith.addf %20, %23 : vector<16x1xf32>
    %25 = math.rsqrt %24 : vector<16x1xf32>
    %26 = vector.broadcast %25 : vector<16x1xf32> to vector<16x32xf32>
    %27 = arith.mulf %22, %26 : vector<16x32xf32>
    %28 = vector.broadcast %8 : vector<1x32xf32> to vector<16x32xf32>
    %29 = arith.mulf %27, %28 : vector<16x32xf32>
    %30 = vector.broadcast %9 : vector<1x32xf32> to vector<16x32xf32>
    %31 = arith.addf %29, %30 : vector<16x32xf32>
    %32 = arith.truncf %31 : vector<16x32xf32> to vector<16x32xbf16>
    %c0_16 = arith.constant 0 : index
    %c0_17 = arith.constant 0 : index
    %33 = vector.load %arg7[%c0_16, %c0_17] : memref<64x32xbf16, #tpu.memory_space<vmem>>, vector<64x32xbf16>
    %cst_18 = arith.constant dense<0.000000e+00> : vector<16x64xf32>
    %34 = tpu.matmul %32, %33, %cst_18 {dimension_numbers = #tpu.dot_dimension_numbers<[1], [1], [0], [0], [0, 0, 1, 0], [], []>} : vector<16x32xbf16>, vector<64x32xbf16>, vector<16x64xf32> -> vector<16x64xf32>
    %c0_19 = arith.constant 0 : index
    %c0_20 = arith.constant 0 : index
    %35 = vector.load %arg8[%c0_19, %c0_20] : memref<1x64xf32, #tpu.memory_space<vmem>>, vector<1x64xf32>
    %36 = vector.broadcast %35 : vector<1x64xf32> to vector<16x64xf32>
    %37 = arith.addf %34, %36 : vector<16x64xf32>
    %cst_21 = arith.constant 0.000000e+00 : f32
    %38 = vector.broadcast %cst_21 : f32 to vector<16x64xf32>
    %39 = arith.maximumf %37, %38 : vector<16x64xf32>
    %40 = arith.truncf %39 : vector<16x64xf32> to vector<16x64xbf16>
    %c0_22 = arith.constant 0 : index
    %c0_23 = arith.constant 0 : index
    %41 = vector.load %arg9[%c0_22, %c0_23] : memref<32x64xbf16, #tpu.memory_space<vmem>>, vector<32x64xbf16>
    %cst_24 = arith.constant dense<0.000000e+00> : vector<16x32xf32>
    %42 = tpu.matmul %40, %41, %cst_24 {dimension_numbers = #tpu.dot_dimension_numbers<[1], [1], [0], [0], [0, 0, 1, 0], [], []>} : vector<16x64xbf16>, vector<32x64xbf16>, vector<16x32xf32> -> vector<16x32xf32>
    %c0_25 = arith.constant 0 : index
    %c0_26 = arith.constant 0 : index
    %43 = vector.load %arg10[%c0_25, %c0_26] : memref<1x32xf32, #tpu.memory_space<vmem>>, vector<1x32xf32>
    %44 = vector.broadcast %43 : vector<1x32xf32> to vector<16x32xf32>
    %45 = arith.addf %42, %44 : vector<16x32xf32>
    %cst_27 = arith.constant 0.000000e+00 : f32
    %46 = vector.broadcast %cst_27 : f32 to vector<16x32xf32>
    %47 = arith.maximumf %45, %46 : vector<16x32xf32>
    %48 = arith.addf %31, %47 : vector<16x32xf32>
    %c0_28 = arith.constant 0 : index
    %c0_29 = arith.constant 0 : index
    %49 = vector.load %arg11[%c0_28, %c0_29] : memref<1x32xf32, #tpu.memory_space<vmem>>, vector<1x32xf32>
    %c0_30 = arith.constant 0 : index
    %c0_31 = arith.constant 0 : index
    %50 = vector.load %arg12[%c0_30, %c0_31] : memref<1x32xf32, #tpu.memory_space<vmem>>, vector<1x32xf32>
    %cst_32 = arith.constant dense<0.000000e+00> : vector<16xf32>
    %51 = vector.multi_reduction <add>, %48, %cst_32 [1] : vector<16x32xf32> to vector<16xf32>
    %52 = vector.shape_cast %51 : vector<16xf32> to vector<16x1xf32>
    %cst_33 = arith.constant 3.200000e+01 : f32
    %53 = vector.broadcast %cst_33 : f32 to vector<16x1xf32>
    %54 = arith.divf %52, %53 : vector<16x1xf32>
    %55 = vector.broadcast %54 : vector<16x1xf32> to vector<16x32xf32>
    %56 = arith.subf %48, %55 : vector<16x32xf32>
    %57 = arith.mulf %56, %56 : vector<16x32xf32>
    %cst_34 = arith.constant dense<0.000000e+00> : vector<16xf32>
    %58 = vector.multi_reduction <add>, %57, %cst_34 [1] : vector<16x32xf32> to vector<16xf32>
    %59 = vector.shape_cast %58 : vector<16xf32> to vector<16x1xf32>
    %cst_35 = arith.constant 3.200000e+01 : f32
    %60 = vector.broadcast %cst_35 : f32 to vector<16x1xf32>
    %61 = arith.divf %59, %60 : vector<16x1xf32>
    %62 = vector.broadcast %54 : vector<16x1xf32> to vector<16x32xf32>
    %63 = arith.subf %48, %62 : vector<16x32xf32>
    %cst_36 = arith.constant 9.99999974E-6 : f32
    %64 = vector.broadcast %cst_36 : f32 to vector<16x1xf32>
    %65 = arith.addf %61, %64 : vector<16x1xf32>
    %66 = math.rsqrt %65 : vector<16x1xf32>
    %67 = vector.broadcast %66 : vector<16x1xf32> to vector<16x32xf32>
    %68 = arith.mulf %63, %67 : vector<16x32xf32>
    %69 = vector.broadcast %49 : vector<1x32xf32> to vector<16x32xf32>
    %70 = arith.mulf %68, %69 : vector<16x32xf32>
    %71 = vector.broadcast %50 : vector<1x32xf32> to vector<16x32xf32>
    %72 = arith.addf %70, %71 : vector<16x32xf32>
    %c0_37 = arith.constant 0 : index
    %c0_38 = arith.constant 0 : index
    %73 = vector.load %arg13[%c0_37, %c0_38] : memref<16x32xf32, #tpu.memory_space<vmem>>, vector<16x32xf32>
    tpu.vector_store %arg13[%c0_37, %c0_38], %72 {strides = array<i32>} : memref<16x32xf32, #tpu.memory_space<vmem>>, vector<16x32xf32>,
    return
  }
  func.func @transform_0(%arg0: i32) -> (i32, i32) {
    %c0_i32 = arith.constant 0 : i32
    %c0_i32_0 = arith.constant 0 : i32
    return %arg0, %c0_i32 : i32, i32
  }
  func.func @transform_1(%arg0: i32) -> (i32, i32) {
    %c0_i32 = arith.constant 0 : i32
    %c0_i32_0 = arith.constant 0 : i32
    return %arg0, %c0_i32 : i32, i32
  }
  func.func @transform_2(%arg0: i32) -> (i32, i32) {
    %c0_i32 = arith.constant 0 : i32
    %c0_i32_0 = arith.constant 0 : i32
    %c0_i32_1 = arith.constant 0 : i32
    return %c0_i32, %c0_i32_0 : i32, i32
  }
  func.func @transform_3(%arg0: i32) -> (i32, i32) {
    %c0_i32 = arith.constant 0 : i32
    %c0_i32_0 = arith.constant 0 : i32
    %c0_i32_1 = arith.constant 0 : i32
    return %c0_i32, %c0_i32_0 : i32, i32
  }
  func.func @transform_4(%arg0: i32) -> (i32, i32) {
    %c0_i32 = arith.constant 0 : i32
    %c0_i32_0 = arith.constant 0 : i32
    %c0_i32_1 = arith.constant 0 : i32
    return %c0_i32, %c0_i32_0 : i32, i32
  }
  func.func @transform_5(%arg0: i32) -> (i32, i32) {
    %c0_i32 = arith.constant 0 : i32
    %c0_i32_0 = arith.constant 0 : i32
    %c0_i32_1 = arith.constant 0 : i32
    return %c0_i32, %c0_i32_0 : i32, i32
  }
  func.func @transform_6(%arg0: i32) -> (i32, i32) {
    %c0_i32 = arith.constant 0 : i32
    %c0_i32_0 = arith.constant 0 : i32
    %c0_i32_1 = arith.constant 0 : i32
    return %c0_i32, %c0_i32_0 : i32, i32
  }
  func.func @transform_7(%arg0: i32) -> (i32, i32) {
    %c0_i32 = arith.constant 0 : i32
    %c0_i32_0 = arith.constant 0 : i32
    %c0_i32_1 = arith.constant 0 : i32
    return %c0_i32, %c0_i32_0 : i32, i32
  }
  func.func @transform_8(%arg0: i32) -> (i32, i32) {
    %c0_i32 = arith.constant 0 : i32
    %c0_i32_0 = arith.constant 0 : i32
    %c0_i32_1 = arith.constant 0 : i32
    return %c0_i32, %c0_i32_0 : i32, i32
  }
  func.func @transform_9(%arg0: i32) -> (i32, i32) {
    %c0_i32 = arith.constant 0 : i32
    %c0_i32_0 = arith.constant 0 : i32
    %c0_i32_1 = arith.constant 0 : i32
    return %c0_i32, %c0_i32_0 : i32, i32
  }
  func.func @transform_10(%arg0: i32) -> (i32, i32) {
    %c0_i32 = arith.constant 0 : i32
    %c0_i32_0 = arith.constant 0 : i32
    %c0_i32_1 = arith.constant 0 : i32
    return %c0_i32, %c0_i32_0 : i32, i32
  }
  func.func @transform_11(%arg0: i32) -> (i32, i32) {
    %c0_i32 = arith.constant 0 : i32
    %c0_i32_0 = arith.constant 0 : i32
    %c0_i32_1 = arith.constant 0 : i32
    return %c0_i32, %c0_i32_0 : i32, i32
  }
  func.func @transform_12(%arg0: i32) -> (i32, i32) {
    %c0_i32 = arith.constant 0 : i32
    %c0_i32_0 = arith.constant 0 : i32
    return %arg0, %c0_i32 : i32, i32
  }
}

</mosaic_0001>

<bundles_post_ra>
// kernel: attention_layer.4
= control target key start
LH: loop header
LB: loop body
LE: loop exit
PB: predicated region body
PF: predicated region fallthrough
CT: control target
= control target key end

     0   :  { %s638_s12 = smov 0   ;;  %s640_s13 = smov 0   ;;  %s704_s0 = inlined_call_operand.vmem [shape: bf16[2,4,8,128], index: 0, kind: input, shape index: {}]   ;;  %s705_s1 = inlined_call_operand.vmem [shape: bf16[2,4,8,128], index: 1, kind: input, shape index: {}]   ;;  %s706_s2 = inlined_call_operand.vmem [shape: bf16[2,4,8,128], index: 2, kind: input, shape index: {}]   ;;  %s707_s3 = inlined_call_operand.vmem [shape: bf16[2,4,8,128], index: 3, kind: output, shape index: {}]  }
   0x1   :  { %s642_s14 = smov 0   ;;  %s644_s15 = smov 0  }
   0x2   :  { %s646_s16 = smov 0  }
   0x3 LB: > { %s22_s17 = sadd.s32 1, %s606_s14  ;;  %s25_s18 = sadd.s32 1, %s610_s15  ;;  %s614_s16 = sphi %s646_s16, %s13_s16   ;;  %s610_s15 = sphi %s644_s15, %s711_s15   ;;  %s606_s14 = sphi %s642_s14, %s710_s14   ;;  %s602_s13 = sphi %s640_s13, %s709_s13   ;;  %s598_s12 = sphi %s638_s12, %s708_s12  }
   0x4   : > { %p23_p0 = scmp.ge.s32.totalorder %s22_s17, 4  ;;  %p502_p1 = scmp.ge.s32.totalorder %s614_s16, 1 }
   0x5   : > { %p186_p2 = scmp.lt.s32.totalorder %s614_s16, 9 }
   0x6   : > { %s713_s17 = smov (%p23_p0, %s22_s17), 0  ;;  %s715_s18 = smov (!%p23_p0, %s25_s18), %s610_s15 }
   0x7   : > { %p187_p3 = pnand %p502_p1, %p186_p2  ;;  %p27_p4 = scmp.ge.s32.totalorder %s715_s18, 2 }
   0x8   : > { %p232_p5 = scmp.lt.s32.totalorder (!%p187_p3), %s602_s13, 1  ;;  %p234_p6 = scmp.lt.s32.totalorder (!%p187_p3), %s598_s12, 3  ;;  %v616_v0 = vmov (!%p187_p3), 0.0   ;;  %vm617_vm0 = vmmov (!%p187_p3), 0   ;;  %v308_v3 = vlaneseq (!%p187_p3)  ;;  %vm314_vm2 = vcmask (!%p187_p3), 64512  }
   0x9   : > { %s717_s18 = smov (%p27_p4, %s715_s18), 0  ;;  %190 = sbr.rel (%p187_p3) target bundleno = 773 (0x305), region = 32 }
   0xa   : > { %518 = vmatprep.subr.bf16.mxu0 (!%p187_p3), %v616_v0  ;;  %520 = vmatprep.mubr.msk.bf16.mxu0 (!%p187_p3), %vm617_vm0, %v616_v0  ;;  %v309_v4 = vshrl.u32 (!%p187_p3), %v308_v3, 7  ;;  %v311_v5 = vand.u32 (!%p187_p3), 127, %v308_v3  ;;  %vm330_vm3 = vcmask (!%p187_p3), 1043456  }
   0xb   : > { %524 = vmatprep.subr.bf16.mxu1 (!%p187_p3), %v616_v0  ;;  %526 = vmatprep.mubr.msk.bf16.mxu1 (!%p187_p3), %vm617_vm0, %v616_v0 }
   0xc   : > { %vm312_vm1 = vcmp.le.s32.totalorder (!%p187_p3), %v311_v5, %v309_v4 }
  0x10   : > { %s719_s13 = smov (!%p232_p5, %s602_s13), 1  ;;  %s721_s12 = smov (!%p234_p6, %s598_s12), 3 }
  0x11   : > { %s503_s19 = sshll.u32 %s719_s13, 2 }
  0x12   : > { %s237_s20 = sadd.s32 %s503_s19, %s721_s12 }
  0x13   : > { %s668_s21 = sshll.u32 %s237_s20, 2 }
  0x14   : > { %s247_s24 = scalar_lea.vmem %s705_s1, %s668_s21  ;;  %s239_s27 = scalar_lea.vmem %s704_s0, %s668_s21 }
  0x15   : > { %v266_v1 = vld [vmem:[%s247_s24] sm:$0xf]  ;;  %s255_s30 = scalar_lea.vmem %s706_s2, %s668_s21  ;;  %s263_s6 = scalar_lea.vmem %s707_s3, %s668_s21 }
  0x16   : > { %519 = vmatpush3.bf16.xpose.msra.mxu0 %v266_v1  ;;  %v265_v2 = vld [vmem:[%s239_s27] sm:$0xf] }
  0x17   : > { %v267_v17 = vld [vmem:[%s255_s30] sm:$0xf] }
  0x18   : > { %v332_v18 = vsel %vm330_vm3, %v267_v17, 0 }
  0x19   : > { %525 = vmatpush3.bf16.msra.mxu1 %v332_v18 }
  0x1d   : > { %521 = vmatmul.mubr.bf16.vlgmr.msra.gmra.mrb[0].mxu0 %v265_v2 }
  0xf0   : > { %v302_v6 = vpop.f32.mrb[0].mxu0 }
  0xf1   : > { %v313_v7 = vsel %vm312_vm1, %v302_v6, -1e+30  ;;  %v522_v8 = vpop.f32.mrb[1].mxu0 }
  0xf2   : > { %v305_v9 = vpop.f32.mrb[2].mxu0  ;;  %v315_v10 = vsel %vm314_vm2, %v313_v7, -inf }
  0xf3   : > { %316 = vmax.xlane.f32.xlu0 %v315_v10  ;;  %v523_v11 = vpop.f32.mrb[3].mxu0 }
 0x180   : > { %v317_v12 = vpop.xlane.xlu0 %316 }
 0x181   : > { %v318_v13 = vsub.f32 %v313_v7, %v317_v12 }
 0x183   : > { %v319_v14 = vmul.f32 1.442695, %v318_v13 }
 0x185   : > { %572 = vpow2.f32 %v319_v14 }
 0x18f   : > { %v573_v15 = vpop.eup %572 }
 0x190   : > { %v321_v16 = vsel %vm314_vm2, %v573_v15, 0.0 }
 0x191   : > { %322 = vadd.xlane.f32.xlu0 %v321_v16 }
 0x21e   : > { %v323_v19 = vpop.xlane.xlu0 %322 }
 0x21f   : > { %574 = vrcp.f32 %v323_v19 }
 0x229   : > { %v575_v20 = vpop.eup %574 }
 0x22a   : > { %v325_v21 = vmul.f32 %v575_v20, %v573_v15 }
 0x22c   : > { %v326_v22 = vpack.c.bf16 %v325_v21, %v325_v21 }
 0x22e   : > { %527 = vmatmul.mubr.msk.bf16.vlgmr.msra.gmra.mrb[0].mxu1 %vm314_vm2, %v326_v22 }
 0x301   : > { %v368_v23 = vpop.f32.mrb[0].mxu1 }
 0x302   : > { %v374_v24 = vpack.c.bf16 %v368_v23, %v368_v23  ;;  %v528_v25 = vpop.f32.mrb[1].mxu1 }
 0x303   : > { %v371_v26 = vpop.f32.mrb[2].mxu1 }
 0x304   : > { %375 = vst [vmem:[%s263_s6] sm:$0xf] %v374_v24  ;;  %v529_v27 = vpop.f32.mrb[3].mxu1 }
 0x305 PF: > { %s13_s16 = sadd.s32 1, %s614_s16   ;;  %s708_s12 = smov %s606_s14 }
 0x306   : > { %p10_p7 = scmp.ge.s32.totalorder %s13_s16, 10   ;;  %s709_s13 = smov %s610_s15 }
 0x307   : > { %s710_s14 = smov %s713_s17  ;;  %s711_s15 = smov %s717_s18 }
 0x308   :  { %12 = sbr.rel (!%p10_p7) target bundleno = 3 (0x3), region = 68 }

// kernel: attention_layer.3
= control target key start
LH: loop header
LB: loop body
LE: loop exit
PB: predicated region body
PF: predicated region fallthrough
CT: control target
= control target key end

     0   :  { %vm67_vm0 = vcmask 261120   ;;  %v188_v0 = vmov 0.0   ;;  %vm189_vm1 = vmmov 0   ;;  %vm138_vm2 = vcmask 781312   ;;  %s250_s1 = inlined_call_operand.vmem [shape: bf16[96,32], index: 1, kind: input, shape index: {}]   ;;  %s251_s0 = inlined_call_operand.vmem [shape: f32[16,32], index: 0, kind: input, shape index: {}]   ;;  %s252_s2 = inlined_call_operand.vmem [shape: f32[1,96], index: 2, kind: input, shape index: {}]   ;;  %s253_s3 = inlined_call_operand.vmem [shape: bf16[16,96], index: 3, kind: output, shape index: {}]  }
   0x1   :  { %164 = vmatprep.subr.bf16.mxu0 %v188_v0  ;;  %v182_v1 = vld [vmem:[%s250_s1] sm:$0xff]   ;;  %176 = vmatprep.mubr.msk.bf16.mxu0 %vm189_vm1, %v188_v0  ;;  %v183_v3 = vld [vmem:[%s250_s1 + $0x8] sm:$0xff]   ;;  %v184_v5 = vld [vmem:[%s250_s1 + $0x10] sm:$0xff]  }
   0x2   :  { %v72_v2 = vsel %vm67_vm0, %v182_v1, 0  ;;  %v75_v4 = vsel %vm67_vm0, %v183_v3, 0  ;;  %v78_v6 = vsel %vm67_vm0, %v184_v5, 0  ;;  %v185_v7 = vld [vmem:[%s250_s1 + $0x18] sm:$0xff]   ;;  %v186_v9 = vld [vmem:[%s250_s1 + $0x20] sm:$0xff]   ;;  %v187_v11 = vld [vmem:[%s250_s1 + $0x28] sm:$0xff]  }
   0x3   :  { %165 = vmatpush3.bf16.xpose.msra.mxu0 %v72_v2  ;;  %v81_v8 = vsel %vm67_vm0, %v185_v7, 0  ;;  %v84_v10 = vsel %vm67_vm0, %v186_v9, 0  ;;  %v87_v12 = vsel %vm67_vm0, %v187_v11, 0  ;;  %v15_v13 = vld [vmem:[%s251_s0] sm:$0xff]  ;;  %v16_v14 = vld [vmem:[%s251_s0 + $0x8] sm:$0xff] }
   0x4   :  { %166 = vmatprep.subr.bf16.mxu0 %v188_v0  ;;  %v17_v15 = vpack.c.bf16 %v16_v14, %v15_v13  ;;  %v145_v16 = vld [vmem:[%s252_s2] ss:$0 sm:$0xff] }
   0xb   :  { %167 = vmatpush3.bf16.xpose.msra.mxu0 %v75_v4 }
   0xc   :  { %168 = vmatprep.subr.bf16.mxu0 %v188_v0 }
  0x13   :  { %169 = vmatpush3.bf16.xpose.msra.mxu0 %v78_v6 }
  0x14   :  { %170 = vmatprep.subr.bf16.mxu0 %v188_v0 }
  0x1b   :  { %171 = vmatpush3.bf16.xpose.msra.mxu0 %v81_v8 }
  0x1c   :  { %172 = vmatprep.subr.bf16.mxu0 %v188_v0 }
  0x23   :  { %173 = vmatpush3.bf16.xpose.msra.mxu0 %v84_v10 }
  0x24   :  { %174 = vmatprep.subr.bf16.mxu0 %v188_v0 }
  0x2b   :  { %175 = vmatpush3.bf16.xpose.msra.mxu0 %v87_v12 }
  0x32   :  { %177 = vmatmul.mubr.msk.bf16.vlgmr.msra.gmra.mrb[0].mxu0 %vm67_vm0, %v17_v15 }
 0x105   :  { %v123_v17 = vpop.f32.mrb[0].mxu0 }
 0x106   :  { %v124_v18 = vadd.f32 %v145_v16, %v123_v17  ;;  %v178_v19 = vpop.f32.mrb[1].mxu0 }
 0x107   :  { %v126_v20 = vpop.f32.mrb[2].mxu0 }
 0x108   :  { %v155_v21 = vpack.c.bf16 %v124_v18, %v124_v18  ;;  %v127_v22 = vadd.f32 %v145_v16, %v126_v20  ;;  %v179_v23 = vpop.f32.mrb[3].mxu0 }
 0x10a   :  { %139 = vst.msk [vmem:[%s253_s3] sm:$0xf] %vm138_vm2, %v155_v21  ;;  %v156_v24 = vpack.c.bf16 %v127_v22, %v127_v22 }
 0x10c   :  { %140 = vst.msk [vmem:[%s253_s3 + $0x4] sm:$0xf] %vm138_vm2, %v156_v24 }

// kernel: attention_layer.5
= control target key start
LH: loop header
LB: loop body
LE: loop exit
PB: predicated region body
PF: predicated region fallthrough
CT: control target
= control target key end

     0   :  { %v508_v1 = vmov 0.0   ;;  %vm73_vm0 = vcmask 261120   ;;  %vm509_vm1 = vmmov 0   ;;  %s676_s0 = inlined_call_operand.vmem [shape: f32[16,32], index: 0, kind: input, shape index: {}]   ;;  %s677_s1 = inlined_call_operand.vmem [shape: bf16[16,32], index: 1, kind: input, shape index: {}]   ;;  %s678_s2 = inlined_call_operand.vmem [shape: bf16[32,32], index: 2, kind: input, shape index: {}]   ;;  %s679_s3 = inlined_call_operand.vmem [shape: f32[1,32], index: 3, kind: input, shape index: {}]   ;;  %s680_s4 = inlined_call_operand.vmem [shape: f32[1,32], index: 4, kind: input, shape index: {}]   ;;  %s681_s5 = inlined_call_operand.vmem [shape: f32[1,32], index: 5, kind: input, shape index: {}]   ;;  %s682_s6 = inlined_call_operand.vmem [shape: bf16[64,32], index: 6, kind: input, shape index: {}]   ;;  %s683_s7 = inlined_call_operand.vmem [shape: f32[1,64], index: 7, kind: input, shape index: {}]   ;;  %s684_s8 = inlined_call_operand.vmem [shape: bf16[32,64], index: 8, kind: input, shape index: {}]   ;;  %s685_s9 = inlined_call_operand.vmem [shape: f32[1,32], index: 9, kind: input, shape index: {}]   ;;  %s686_s10 = inlined_call_operand.vmem [shape: f32[1,32], index: 10, kind: input, shape index: {}]   ;;  %s687_s11 = inlined_call_operand.vmem [shape: f32[1,32], index: 11, kind: input, shape index: {}]   ;;  %s688_s12 = inlined_call_operand.hbm [shape: f32[16,32], index: 12, kind: output, shape index: {}]  }
   0x1   :  { %v467_v0 = vld [vmem:[%s678_s2] sm:$0xff]   ;;  %434 = vmatprep.subr.bf16.mxu0 %v508_v1  ;;  %442 = vmatprep.subr.bf16.mxu1 %v508_v1  ;;  %v468_v3 = vld [vmem:[%s678_s2 + $0x8] sm:$0xff]  }
   0x2   :  { %v78_v2 = vsel %vm73_vm0, %v467_v0, 0  ;;  %438 = vmatprep.mubr.msk.bf16.mxu0 %vm509_vm1, %v508_v1  ;;  %450 = vmatprep.mubr.msk.bf16.mxu1 %vm509_vm1, %v508_v1 }
   0x3   :  { %435 = vmatpush3.bf16.xpose.msra.mxu0 %v78_v2 }
   0x4   :  { %436 = vmatprep.subr.bf16.mxu0 %v508_v1 }
   0x5   :  { %17 = vsyncpa [#allocation3], 0  ;;  %v81_v4 = vsel %vm73_vm0, %v468_v3, 0  ;;  %v469_v5 = vld [vmem:[%s677_s1] sm:$0xff]   ;;  %v44_v12 = vld [vmem:[%s676_s0 + $0x8] sm:$0xff]  ;;  %vm287_vm2 = vcmask 523264  }
   0x6   :  { %v404_v6 = vld [vmem:[%s679_s3] ss:$0 sm:$0xff]  ;;  %v471_v31 = vld [vmem:[%s682_s6 + $0x8] sm:$0xff]   ;;  %v472_v33 = vld [vmem:[%s682_s6 + $0x10] sm:$0xff]   ;;  %s510_s28 = smov [#allocation2]  }
   0x7   :  { %v43_v8 = vld [vmem:[%s676_s0] sm:$0xff]  ;;  %v214_v32 = vsel %vm73_vm0, %v471_v31, 0  ;;  %v217_v34 = vsel %vm73_vm0, %v472_v33, 0  ;;  %v473_v35 = vld [vmem:[%s682_s6 + $0x18] sm:$0xff]   ;;  %v475_v56 = vld [vmem:[%s684_s8 + $0x8] sm:$0xff]   ;;  %s393_s29 = sshll.u32 %s510_s28, 4  ;;  %s394_s29 = int_to_ptr.vmem [resolvable:$true] %s393_s29 }
   0x8   :  { %v470_v19 = vld [vmem:[%s682_s6] sm:$0xff]   ;;  %v220_v36 = vsel %vm73_vm0, %v473_v35, 0  ;;  %v295_v57 = vsel %vm287_vm2, %v475_v56, 0  ;;  %s484_s30 = scalar_lea.vmem %s394_s29, 256  ;;  %p489_p1 = scmp.lt.s32.totalorder %s394_s29, %s394_s29 }
   0x9   :  { %v211_v20 = vsel %vm73_vm0, %v470_v19, 0  ;;  %v474_v37 = vld [vmem:[%s684_s8] sm:$0xff]   ;;  %p485_p0 = scmp.ne.s32.totalorder %s394_s29, %s484_s30  ;;  %p490_p2 = scmp.lt.s32.totalorder %s484_s30, %s484_s30 }
   0xa   :  { %443 = vmatpush3.bf16.xpose.msra.mxu1 %v211_v20  ;;  %v292_v38 = vsel %vm287_vm2, %v474_v37, 0  ;;  %v409_v47 = vld [vmem:[%s680_s4] ss:$0 sm:$0xff] }
   0xb   :  { %437 = vmatpush3.bf16.xpose.msra.mxu0 %v81_v4  ;;  %444 = vmatprep.subr.bf16.mxu1 %v508_v1  ;;  %v410_v51 = vld [vmem:[%s681_s5] ss:$0 sm:$0xff]  ;;  %p491_p3 = por %p490_p2, %p489_p1 }
   0xc   :  { %454 = vmatprep.subr.bf16.mxu0 %v508_v1  ;;  %v411_v58 = vld [vmem:[%s683_s7] ss:$0 sm:$0xff] }
   0xd   :  { %v417_v4 = vld [vmem:[%s685_s9] ss:$0 sm:$0xff]  ;;  %p492_p4 = pnand %p491_p3, %p485_p0 }
   0xe   :  { %v422_v37 = vld [vmem:[%s687_s11] ss:$0 sm:$0xff] }
  0x12   :  { %439 = vmatmul.mubr.msk.bf16.vlgmr.msra.gmra.mrb[0].mxu0 %vm73_vm0, %v469_v5  ;;  %445 = vmatpush3.bf16.xpose.msra.mxu1 %v214_v32 }
  0x13   :  { %458 = vmatprep.mubr.msk.bf16.mxu0 %vm509_vm1, %v508_v1  ;;  %446 = vmatprep.subr.bf16.mxu1 %v508_v1 }
  0x14   :  { %455 = vmatpush3.bf16.xpose.msra.mxu0 %v292_v38 }
  0x15   :  { %456 = vmatprep.subr.bf16.mxu0 %v508_v1 }
  0x1a   :  { %447 = vmatpush3.bf16.xpose.msra.mxu1 %v217_v34  ;;  %v421_v34 = vld [vmem:[%s686_s10] ss:$0 sm:$0xff] }
  0x1b   :  { %448 = vmatprep.subr.bf16.mxu1 %v508_v1 }
  0x1c   :  { %457 = vmatpush3.bf16.xpose.msra.mxu0 %v295_v57 }
  0x22   :  { %449 = vmatpush3.bf16.xpose.msra.mxu1 %v220_v36 }
  0xe5   :  { %v117_v7 = vpop.f32.mrb[0].mxu0 }
  0xe6   :  { %v118_v9 = vadd.f32 %v404_v6, %v117_v7  ;;  %v440_v10 = vpop.f32.mrb[1].mxu0 }
  0xe7   :  { %v120_v11 = vpop.f32.mrb[2].mxu0 }
  0xe8   :  { %v121_v13 = vadd.f32 %v404_v6, %v120_v11  ;;  %v441_v14 = vpop.f32.mrb[3].mxu0  ;;  %v124_v15 = vadd.f32 %v118_v9, %v43_v8 }
  0xea   :  { %v128_v16 = vsel %vm73_vm0, %v124_v15, 0.0  ;;  %v125_v17 = vadd.f32 %v121_v13, %v44_v12 }
  0xeb   :  { %129 = vadd.xlane.f32.xlu0 %v128_v16 }
  0xec   :  { %v131_v18 = vsel %vm73_vm0, %v125_v17, 0.0 }
  0xef   :  { %132 = vadd.xlane.f32.xlu0 %v131_v18 }
 0x178   :  { %v130_v21 = vpop.xlane.xlu0 %129 }
 0x179   :  { %v135_v22 = vmul.f32 0.03125, %v130_v21 }
 0x17b   :  { %v137_v23 = vsub.f32 %v124_v15, %v135_v22 }
 0x17c   :  { %v133_v24 = vpop.xlane.xlu0 %132 }
 0x17d   :  { %v136_v25 = vmul.f32 0.03125, %v133_v24  ;;  %v139_v26 = vmul.f32 %v137_v23, %v137_v23 }
 0x17f   :  { %v138_v27 = vsub.f32 %v125_v17, %v136_v25  ;;  %v141_v28 = vsel %vm73_vm0, %v139_v26, 0.0 }
 0x180   :  { %142 = vadd.xlane.f32.xlu1 %v141_v28 }
 0x181   :  { %v140_v29 = vmul.f32 %v138_v27, %v138_v27 }
 0x183   :  { %v144_v30 = vsel %vm73_vm0, %v140_v29, 0.0 }
 0x184   :  { %145 = vadd.xlane.f32.xlu1 %v144_v30 }
 0x20d   :  { %v143_v39 = vpop.xlane.xlu1 %142 }
 0x20e   :  { %v147_v40 = vmul.f32 0.03125, %v143_v39 }
 0x210   :  { %v149_v41 = vadd.f32 1e-05, %v147_v40 }
 0x211   :  { %v146_v42 = vpop.xlane.xlu1 %145 }
 0x212   :  { %476 = vrsqrt.f32 %v149_v41  ;;  %v148_v43 = vmul.f32 0.03125, %v146_v42 }
 0x214   :  { %v150_v44 = vadd.f32 1e-05, %v148_v43 }
 0x216   :  { %478 = vrsqrt.f32 %v150_v44 }
 0x21c   :  { %v477_v45 = vpop.eup %476 }
 0x21d   :  { %v153_v46 = vmul.f32 %v477_v45, %v137_v23 }
 0x21f   :  { %v161_v50 = vmul.f32 %v409_v47, %v153_v46 }
 0x220   :  { %v479_v48 = vpop.eup %478 }
 0x221   :  { %v154_v49 = vmul.f32 %v479_v48, %v138_v27  ;;  %v169_v53 = vadd.f32 %v410_v51, %v161_v50 }
 0x223   :  { %v162_v52 = vmul.f32 %v409_v47, %v154_v49 }
 0x225   :  { %v170_v54 = vadd.f32 %v410_v51, %v162_v52 }
 0x227   :  { %v171_v55 = vpack.c.bf16 %v170_v54, %v169_v53 }
 0x229   :  { %451 = vmatmul.mubr.msk.bf16.vlgmr.msra.gmra.mrb[0].mxu1 %vm73_vm0, %v171_v55 }
 0x2fc   :  { %v256_v59 = vpop.f32.mrb[0].mxu1 }
 0x2fd   :  { %v257_v60 = vadd.f32 %v411_v58, %v256_v59  ;;  %v452_v61 = vpop.f32.mrb[1].mxu1 }
 0x2fe   :  { %v259_v62 = vpop.f32.mrb[2].mxu1 }
 0x2ff   :  { %v260_v63 = vadd.f32 %v411_v58, %v259_v62  ;;  %v453_v0 = vpop.f32.mrb[3].mxu1  ;;  %v263_v1 = vmax.f32 %v257_v60, 0.0 }
 0x301   :  { %v264_v2 = vmax.f32 %v260_v63, 0.0 }
 0x303   :  { %v265_v3 = vpack.c.bf16 %v264_v2, %v263_v1 }
 0x305   :  { %459 = vmatmul.mubr.msk.bf16.vlgmr.msra.gmra.mrb[4].mxu0 %vm287_vm2, %v265_v3 }
 0x3d8   :  { %v331_v5 = vpop.f32.mrb[4].mxu0 }
 0x3d9   :  { %v332_v6 = vadd.f32 %v417_v4, %v331_v5  ;;  %v460_v7 = vpop.f32.mrb[5].mxu0 }
 0x3da   :  { %v334_v8 = vpop.f32.mrb[6].mxu0 }
 0x3db   :  { %v338_v9 = vmax.f32 %v332_v6, 0.0  ;;  %v335_v10 = vadd.f32 %v417_v4, %v334_v8  ;;  %v461_v11 = vpop.f32.mrb[7].mxu0 }
 0x3dd   :  { %v339_v12 = vmax.f32 %v335_v10, 0.0  ;;  %v340_v13 = vadd.f32 %v338_v9, %v169_v53 }
 0x3df   :  { %v344_v14 = vsel %vm73_vm0, %v340_v13, 0.0  ;;  %v341_v15 = vadd.f32 %v339_v12, %v170_v54 }
 0x3e0   :  { %345 = vadd.xlane.f32.xlu0 %v344_v14 }
 0x3e1   :  { %v347_v16 = vsel %vm73_vm0, %v341_v15, 0.0 }
 0x3e2   :  { %348 = vadd.xlane.f32.xlu1 %v347_v16 }
 0x46d   :  { %v346_v17 = vpop.xlane.xlu0 %345 }
 0x46e   :  { %v350_v18 = vmul.f32 0.03125, %v346_v17 }
 0x46f   :  { %v349_v19 = vpop.xlane.xlu1 %348 }
 0x470   :  { %v352_v20 = vsub.f32 %v340_v13, %v350_v18  ;;  %v351_v21 = vmul.f32 0.03125, %v349_v19 }
 0x472   :  { %v353_v22 = vsub.f32 %v341_v15, %v351_v21  ;;  %v354_v23 = vmul.f32 %v352_v20, %v352_v20 }
 0x474   :  { %v356_v24 = vsel %vm73_vm0, %v354_v23, 0.0  ;;  %v355_v25 = vmul.f32 %v353_v22, %v353_v22 }
 0x475   :  { %357 = vadd.xlane.f32.xlu0 %v356_v24 }
 0x476   :  { %v359_v26 = vsel %vm73_vm0, %v355_v25, 0.0 }
 0x477   :  { %360 = vadd.xlane.f32.xlu1 %v359_v26 }
 0x502   :  { %v358_v27 = vpop.xlane.xlu0 %357 }
 0x503   :  { %v362_v28 = vmul.f32 0.03125, %v358_v27 }
 0x504   :  { %v361_v29 = vpop.xlane.xlu1 %360 }
 0x505   :  { %v364_v30 = vadd.f32 1e-05, %v362_v28  ;;  %v363_v31 = vmul.f32 0.03125, %v361_v29 }
 0x507   :  { %480 = vrsqrt.f32 %v364_v30  ;;  %v365_v32 = vadd.f32 1e-05, %v363_v31 }
 0x509   :  { %482 = vrsqrt.f32 %v365_v32 }
 0x511   :  { %v481_v33 = vpop.eup %480 }
 0x512   :  { %v368_v35 = vmul.f32 %v481_v33, %v352_v20 }
 0x513   :  { %v483_v36 = vpop.eup %482 }
 0x514   :  { %v369_v38 = vmul.f32 %v483_v36, %v353_v22  ;;  %v376_v39 = vmul.f32 %v421_v34, %v368_v35 }
 0x516   :  { %v377_v40 = vmul.f32 %v421_v34, %v369_v38  ;;  %v384_v41 = vadd.f32 %v422_v37, %v376_v39 }
 0x518   :  { %v385_v42 = vadd.f32 %v422_v37, %v377_v40  ;;  %386 = vst.msk [vmem:[#allocation2] sm:$0xff] %vm73_vm0, %v384_v41 }
 0x51a   :  { %387 = vst.msk [vmem:[#allocation2 + $0x8] sm:$0xff] %vm73_vm0, %v385_v42 }
 0x51b   :  { %495 = shalt.err (!%p492_p4)
}
 0x51c   :  { %s496_s13 = scalar_lea.hbm %s688_s12, 256 }
 0x51d   :  { %p497_p5 = scmp.ne.s32.totalorder %s688_s12, %s496_s13  ;;  %p500_p6 = scmp.lt.u32.totalorder %s496_s13, %s688_s12 }
 0x51f   :  { %p502_p7 = pnand %p500_p6, %p497_p5 }
 0x521   :  { %505 = shalt.err (!%p502_p7)
}
 0x522   :  { %s511_s15 = smov 128   ;;  %s512_s16 = smov 8  }
 0x523   :  { %399 = dma.vmem_to_hbm [thread:$0]  %s394_s29, 256, %s688_s12, [#allocation3], %s511_s15, %s511_s15, %s512_s16  }
 0x524   :  { %506 = dma.done.wait [#allocation3], 256  }
 0x525   :  { %507 = vsyncadd [#allocation3], 4294967040 }
 0x526   :  { %403 = vsyncpa [#allocation3], 1 }

</bundles_post_ra>
